<compile_context>
chip_gen: v5e
topology: v5e:2x2
jax: 0.10.0
libtpu: 0.0.40
codegen_flags: <defaults>
</compile_context>

<pallas_src>
import jax
import jax.numpy as jnp
from jax.experimental import pallas as pl
from jax.experimental.pallas import tpu as pltpu


def _copy_kernel(x_ref, o_ref):
    # Pure copy: the double transpose(1,2) is the identity at the value level.
    o_ref[...] = x_ref[...]


def _sublane_multiple(dtype) -> int:
    itemsize = jnp.dtype(dtype).itemsize
    if itemsize >= 4:
        return 8
    if itemsize == 2:
        return 16
    return 32


def _choose_lane_width(total: int) -> int:
    # Largest lane-dense width (multiple of 128) that divides the flat size.
    for lane in (1024, 512, 256, 128):
        if total % lane == 0:
            return lane
    return 0  # not divisible by 128 -> fall back to single-block copy


def _choose_tile_rows(rows: int, lane: int, itemsize: int, sub: int) -> int:
    # Target ~2 MiB tiles; keep the sublane dim a multiple of `sub` (or the
    # full extent, which is always legal).
    max_bytes = 2 * 1024 * 1024
    max_rows = max(sub, (max_bytes // (lane * itemsize)) // sub * sub)
    if rows <= max_rows:
        return rows
    for t in range(max_rows, sub - 1, -sub):
        if rows % t == 0:
            return t
    return rows  # no clean divisor: one big block (full extent is legal)


def contiguous_many_transposes(x):
    """Identity forward of ContiguousManyTransposesModel via a Pallas copy kernel."""
    orig_shape = x.shape
    total = x.size
    itemsize = jnp.dtype(x.dtype).itemsize
    sub = _sublane_multiple(x.dtype)

    lane = _choose_lane_width(total)

    if lane == 0:
        # Fallback: whole array as a single block (block shape == full shape
        # is always legal regardless of (8, 128) divisibility).
        return pl.pallas_call(
            _copy_kernel,
            out_shape=jax.ShapeDtypeStruct(orig_shape, x.dtype),
            in_specs=[pl.BlockSpec(orig_shape, lambda: (0,) * len(orig_shape))],
            out_specs=pl.BlockSpec(orig_shape, lambda: (0,) * len(orig_shape)),
        )(x)

    rows = total // lane
    tile_rows = _choose_tile_rows(rows, lane, itemsize, sub)
    num_tiles = rows // tile_rows

    x2d = x.reshape(rows, lane)

    tile_bytes = tile_rows * lane * itemsize
    # 2 double-buffered copies each for input and output, plus headroom.
    vmem_limit = min(48 * 1024 * 1024, max(4 * 1024 * 1024, 4 * tile_bytes + 2 * 1024 * 1024))

    y2d = pl.pallas_call(
        _copy_kernel,
        out_shape=jax.ShapeDtypeStruct((rows, lane), x.dtype),
        grid=(num_tiles,),
        in_specs=[pl.BlockSpec((tile_rows, lane), lambda i: (i, 0))],
        out_specs=pl.BlockSpec((tile_rows, lane), lambda i: (i, 0)),
        compiler_params=pltpu.CompilerParams(
            dimension_semantics=("parallel",),
            vmem_limit_bytes=vmem_limit,
        ),
    )(x2d)

    return y2d.reshape(orig_shape)


if __name__ == "__main__":
    key = jax.random.PRNGKey(0)
    x = jax.random.normal(key, (2, 4, 16, 16), dtype=jnp.float32)

    y = contiguous_many_transposes(x)
    y = jax.block_until_ready(y)

    # Reference semantics: transpose(1,2) twice == identity.
    ref = jnp.swapaxes(jnp.swapaxes(x, 1, 2), 1, 2)
    assert y.shape == x.shape and y.dtype == x.dtype
    assert jnp.array_equal(y, ref)

    print("KERNEL_OK")
</pallas_src>

<mosaic_0001>
module attributes {stable_mosaic.version = 11 : i64} {
  func.func @_copy_kernel(%arg0: i32, %arg1: memref<2x1024xf32, #tpu.memory_space<vmem>>, %arg2: memref<2x1024xf32, #tpu.memory_space<vmem>>) attributes {dimension_semantics = [#tpu.dimension_semantics<parallel>], iteration_bounds = array<i64: 1>, scalar_prefetch = 0 : i64, scratch_operands = 0 : i64, tpu.core_type = #tpu.core_type<tc>, window_params = [{transform_indices = @transform_0, window_bounds = array<i64: 2, 1024>}, {transform_indices = @transform_1, window_bounds = array<i64: 2, 1024>}]} {
    %c0 = arith.constant 0 : index
    %c0_0 = arith.constant 0 : index
    %0 = vector.load %arg1[%c0, %c0_0] : memref<2x1024xf32, #tpu.memory_space<vmem>>, vector<2x1024xf32>
    %c0_1 = arith.constant 0 : index
    %c0_2 = arith.constant 0 : index
    %1 = vector.load %arg2[%c0_1, %c0_2] : memref<2x1024xf32, #tpu.memory_space<vmem>>, vector<2x1024xf32>
    tpu.vector_store %arg2[%c0_1, %c0_2], %0 {strides = array<i32>} : memref<2x1024xf32, #tpu.memory_space<vmem>>, vector<2x1024xf32>,
    return
  }
  func.func @transform_0(%arg0: i32) -> (i32, i32) {
    %c0_i32 = arith.constant 0 : i32
    %c0_i32_0 = arith.constant 0 : i32
    return %arg0, %c0_i32 : i32, i32
  }
  func.func @transform_1(%arg0: i32) -> (i32, i32) {
    %c0_i32 = arith.constant 0 : i32
    %c0_i32_0 = arith.constant 0 : i32
    return %arg0, %c0_i32 : i32, i32
  }
}

</mosaic_0001>

<bundles_post_ra>
// kernel: tpu_custom_call.1
= control target key start
LH: loop header
LB: loop body
LE: loop exit
PB: predicated region body
PF: predicated region fallthrough
CT: control target
= control target key end

     0   :  { %6 = vsyncpa [#allocation3], 0  ;;  %s116_s0 = inlined_call_operand.hbm [shape: f32[2,1024], index: 0, kind: input, shape index: {}]   ;;  %s117_s1 = inlined_call_operand.hbm [shape: f32[2,1024], index: 1, kind: output, shape index: {}]  }
   0x1   :  { %7 = vsyncpa [#allocation4], 0  ;;  %s13_s8 = sshll.u32 %s116_s0, 4  ;;  %s98_s9 = smov [#allocation2]   ;;  %s14_s8 = int_to_ptr.hbm [resolvable:$true] %s13_s8 }
   0x2   :  { %s15_s10 = sshll.u32 %s98_s9, 4  ;;  %s16_s10 = int_to_ptr.vmem [resolvable:$true] %s15_s10 }
   0x3   :  { %18 = dma.hbm_to_vmem [thread:$0]  %s14_s8, 256, %s16_s10, [#allocation3]  }
   0x4   :  { %94 = dma.done.wait [#allocation3], 256  }
   0x5   :  { %95 = vsyncadd [#allocation3], 4294967040  ;;  %s99_s11 = smov [#allocation5]   ;;  %s34_s15 = sshll.u32 %s117_s1, 4  ;;  %v23_v0 = vld [vmem:[#allocation2] sm:$0xff]  ;;  %v24_v1 = vld [vmem:[#allocation2 + $0x8] sm:$0xff]  ;;  %s35_s15 = int_to_ptr.hbm [resolvable:$true] %s34_s15 }
   0x6   :  { %s32_s12 = sshll.u32 %s99_s11, 4  ;;  %25 = vst [vmem:[#allocation5] sm:$0xff] %v23_v0  ;;  %s33_s12 = int_to_ptr.vmem [resolvable:$true] %s32_s12 }
   0x7   :  { %26 = vst [vmem:[#allocation5 + $0x8] sm:$0xff] %v24_v1 }
   0x8   :  { %37 = dma.vmem_to_hbm [thread:$0]  %s33_s12, 256, %s35_s15, [#allocation4]  }
   0x9   :  { %96 = dma.done.wait [#allocation4], 256  }
   0xa   :  { %97 = vsyncadd [#allocation4], 4294967040 }
   0xb   :  { %42 = vsyncpa [#allocation3], 1 }
   0xc   :  { %43 = vsyncpa [#allocation4], 1 }

</bundles_post_ra>
